<compile_context>
chip_gen: v5e
topology: v5e:2x2
jax: 0.10.0
libtpu: 0.0.40
codegen_flags: <defaults>
</compile_context>

<pallas_src>
import jax
import jax.numpy as jnp
from jax.experimental import pallas as pl
from jax.experimental.pallas import tpu as pltpu


def _round_up(x: int, m: int) -> int:
    return ((x + m - 1) // m) * m


def _pooler_kernel(x_ref, w_ref, b_ref, o_ref):
    # x_ref: (TB, H)   tile of input rows
    # w_ref: (H,  TN)  pre-transposed weight tile ([in, out] layout)
    # b_ref: (1,  TN)  bias tile
    # o_ref: (TB, TN)  output tile
    acc = jnp.dot(x_ref[...], w_ref[...], preferred_element_type=jnp.float32)
    acc = acc + b_ref[...].astype(jnp.float32)
    o_ref[...] = jnp.tanh(acc).astype(o_ref.dtype)


def roberta_pooler(x, weight, bias, *, tile_b=1024, vmem_budget_bytes=28 * 1024 * 1024):
    """RobertaPooler forward:  tanh(x @ weight.T + bias).

    x:      [B, H]  activations (f32 or bf16)
    weight: [H, H]  PyTorch nn.Linear layout (out_features, in_features)
    bias:   [H]
    """
    B, H = x.shape
    assert weight.shape == (H, H) and bias.shape == (H,)

    # One-time layout fix: [out, in] -> [in, out].  Amortized over all batch
    # tiles; in production, store the weight pre-transposed and skip this.
    w_t = weight.T
    b2d = bias.reshape(1, H)

    itemsize = jnp.dtype(x.dtype).itemsize
    sub = 16 if x.dtype == jnp.bfloat16 else 8  # sublane granularity (packing)

    # ---- Batch tile: biggest that fits the VMEM budget, capped by tile_b and
    # by the (rounded-up) batch, multiple of the sublane granularity.
    fixed = 2 * H * H * itemsize + 2 * H * itemsize          # weight (2 bufs) + bias
    per_row = 2 * (H + H) * itemsize                         # x + out, double-buffered
    avail = vmem_budget_bytes - fixed
    if avail >= per_row * sub:
        tb_fit = (avail // per_row) // sub * sub
    else:
        tb_fit = sub
    tb = max(sub, min(_round_up(tile_b, sub), _round_up(B, sub), tb_fit))
    grid_b = pl.cdiv(B, tb)

    # ---- Out-feature tiles: keep the whole weight resident as one block unless
    # the batch is a single tile; then split in two so both v7x TensorCores
    # have a parallel grid step (costs no extra weight traffic).
    if grid_b == 1 and H % 256 == 0:
        n_tiles, tn = 2, H // 2
    else:
        n_tiles, tn = 1, H

    footprint = (2 * H * H + 2 * tb * H + 2 * tb * tn + 4 * tn) * itemsize
    vmem_limit = int(min(max(32 * 1024 * 1024, footprint + (4 << 20)), 64 * 1024 * 1024))

    cost = pl.CostEstimate(
        flops=2 * B * H * H,
        transcendentals=B * H,
        bytes_accessed=(B * H + H * H + H + B * H) * itemsize,
    )

    out = pl.pallas_call(
        _pooler_kernel,
        out_shape=jax.ShapeDtypeStruct((B, H), x.dtype),
        grid_spec=pltpu.PrefetchScalarGridSpec(
            num_scalar_prefetch=0,
            # Batch is the innermost grid axis -> the weight/bias block index is
            # constant across consecutive steps, so they are not re-streamed.
            grid=(n_tiles, grid_b),
            in_specs=[
                pl.BlockSpec((tb, H), lambda j, i: (i, 0)),   # x rows tile
                pl.BlockSpec((H, tn), lambda j, i: (0, j)),   # W.T tile  [in, out-tile]
                pl.BlockSpec((1, tn), lambda j, i: (0, j)),   # bias tile
            ],
            out_specs=pl.BlockSpec((tb, tn), lambda j, i: (i, j)),
        ),
        compiler_params=pltpu.CompilerParams(
            dimension_semantics=("parallel", "parallel"),
            vmem_limit_bytes=vmem_limit,
        ),
        cost_estimate=cost,
    )(x, w_t, b2d)
    return out


def _reference(x, weight, bias):
    return jnp.tanh(
        jnp.dot(x, weight.T, precision=jax.lax.Precision.HIGHEST) + bias
    )


if __name__ == "__main__":
    key = jax.random.PRNGKey(0)

    def make(key, B, H):
        kx, kw, kb = jax.random.split(key, 3)
        x = jax.random.normal(kx, (B, H), dtype=jnp.float32)
        w = jax.random.normal(kw, (H, H), dtype=jnp.float32) * 0.02  # [out, in]
        b = jax.random.normal(kb, (H,), dtype=jnp.float32) * 0.02
        return x, w, b

    k1, k2, k3 = jax.random.split(key, 3)

    # 1) B=10, H=128: single grid step, exercises the masked partial batch block.
    x, w, b = make(k1, 10, 128)
    out = jax.block_until_ready(roberta_pooler(x, w, b))
    assert out.shape == (10, 128)
    assert jnp.allclose(out, _reference(x, w, b), atol=1e-4, rtol=1e-4)

    # 2) B=8, H=256: single batch tile -> 2-way out-feature split (v7x path).
    x, w, b = make(k2, 8, 256)
    out = jax.block_until_ready(roberta_pooler(x, w, b))
    assert out.shape == (8, 256)
    assert jnp.allclose(out, _reference(x, w, b), atol=1e-4, rtol=1e-4)

    # 3) B=40, H=256, small tile_b: multiple batch tiles over a resident weight
    #    block plus a partial last block.
    x, w, b = make(k3, 40, 256)
    out = jax.block_until_ready(roberta_pooler(x, w, b, tile_b=16))
    assert out.shape == (40, 256)
    assert jnp.allclose(out, _reference(x, w, b), atol=1e-4, rtol=1e-4)

    print("KERNEL_OK")
</pallas_src>

<mosaic_0001>
module attributes {stable_mosaic.version = 11 : i64} {
  func.func @_pooler_kernel(%arg0: i32, %arg1: i32, %arg2: memref<16x128xf32, #tpu.memory_space<vmem>>, %arg3: memref<128x128xf32, #tpu.memory_space<vmem>>, %arg4: memref<1x128xf32, #tpu.memory_space<vmem>>, %arg5: memref<16x128xf32, #tpu.memory_space<vmem>>) attributes {dimension_semantics = [#tpu.dimension_semantics<parallel>, #tpu.dimension_semantics<parallel>], iteration_bounds = array<i64: 1, 1>, scalar_prefetch = 0 : i64, scratch_operands = 0 : i64, tpu.core_type = #tpu.core_type<tc>, window_params = [{transform_indices = @transform_0, window_bounds = array<i64: 16, 128>}, {transform_indices = @transform_1, window_bounds = array<i64: 128, 128>}, {transform_indices = @transform_2, window_bounds = array<i64: 1, 128>}, {transform_indices = @transform_3, window_bounds = array<i64: 16, 128>}]} {
    %c0 = arith.constant 0 : index
    %c0_0 = arith.constant 0 : index
    %0 = vector.load %arg2[%c0, %c0_0] : memref<16x128xf32, #tpu.memory_space<vmem>>, vector<16x128xf32>
    %c0_1 = arith.constant 0 : index
    %c0_2 = arith.constant 0 : index
    %1 = vector.load %arg3[%c0_1, %c0_2] : memref<128x128xf32, #tpu.memory_space<vmem>>, vector<128x128xf32>
    %cst = arith.constant dense<0.000000e+00> : vector<16x128xf32>
    %2 = tpu.matmul %0, %1, %cst {dimension_numbers = #tpu.dot_dimension_numbers<[1], [0], [0], [1], [0, 0, 1, 1], [], []>} : vector<16x128xf32>, vector<128x128xf32>, vector<16x128xf32> -> vector<16x128xf32>
    %c0_3 = arith.constant 0 : index
    %c0_4 = arith.constant 0 : index
    %3 = vector.load %arg4[%c0_3, %c0_4] : memref<1x128xf32, #tpu.memory_space<vmem>>, vector<1x128xf32>
    %4 = vector.broadcast %3 : vector<1x128xf32> to vector<16x128xf32>
    %5 = arith.addf %2, %4 : vector<16x128xf32>
    %6 = math.tanh %5 : vector<16x128xf32>
    %c0_5 = arith.constant 0 : index
    %c0_6 = arith.constant 0 : index
    %7 = vector.load %arg5[%c0_5, %c0_6] : memref<16x128xf32, #tpu.memory_space<vmem>>, vector<16x128xf32>
    tpu.vector_store %arg5[%c0_5, %c0_6], %6 {strides = array<i32>} : memref<16x128xf32, #tpu.memory_space<vmem>>, vector<16x128xf32>,
    return
  }
  func.func @transform_0(%arg0: i32, %arg1: i32) -> (i32, i32) {
    %c0_i32 = arith.constant 0 : i32
    %c0_i32_0 = arith.constant 0 : i32
    return %arg1, %c0_i32 : i32, i32
  }
  func.func @transform_1(%arg0: i32, %arg1: i32) -> (i32, i32) {
    %c0_i32 = arith.constant 0 : i32
    %c0_i32_0 = arith.constant 0 : i32
    return %c0_i32, %arg0 : i32, i32
  }
  func.func @transform_2(%arg0: i32, %arg1: i32) -> (i32, i32) {
    %c0_i32 = arith.constant 0 : i32
    %c0_i32_0 = arith.constant 0 : i32
    return %c0_i32, %arg0 : i32, i32
  }
  func.func @transform_3(%arg0: i32, %arg1: i32) -> (i32, i32) {
    %c0_i32 = arith.constant 0 : i32
    return %arg1, %arg0 : i32, i32
  }
}

</mosaic_0001>

<bundles_post_ra>
// kernel: tpu_custom_call.1
= control target key start
LH: loop header
LB: loop body
LE: loop exit
PB: predicated region body
PF: predicated region fallthrough
CT: control target
= control target key end

     0   :  { %8 = vsyncpa [#allocation3], 0  ;;  %s266_s0 = inlined_call_operand.hbm [shape: f32[10,128], index: 0, kind: input, shape index: {}]   ;;  %s267_s1 = inlined_call_operand.hbm [shape: f32[128,128], index: 1, kind: input, shape index: {}]   ;;  %s268_s2 = inlined_call_operand.vmem [shape: f32[1,128], index: 2, kind: input, shape index: {}]   ;;  %s269_s3 = inlined_call_operand.hbm [shape: f32[10,128], index: 3, kind: output, shape index: {}]  }
   0x1   :  { %9 = vsyncpa [#allocation6], 0 }
   0x2   :  { %10 = vsyncpa [#allocation4], 0  ;;  %s15_s14 = sshll.u32 %s266_s0, 4  ;;  %s220_s15 = smov [#allocation2]   ;;  %s16_s14 = int_to_ptr.hbm [resolvable:$true] %s15_s14 }
   0x3   :  { %s17_s16 = sshll.u32 %s220_s15, 4  ;;  %s28_s19 = sshll.u32 %s267_s1, 4  ;;  %s18_s16 = int_to_ptr.vmem [resolvable:$true] %s17_s16  ;;  %s29_s19 = int_to_ptr.hbm [resolvable:$true] %s28_s19 }
   0x4   :  { %s221_s20 = smov 128   ;;  %s222_s21 = smov 8  }
   0x5   :  { %23 = dma.hbm_to_vmem [thread:$0]  %s16_s14, 256, %s18_s16, [#allocation3], %s221_s20, %s221_s20, %s222_s21  }
   0x6   :  { %s223_s22 = smov [#allocation5]  }
   0x7   :  { %s30_s23 = sshll.u32 %s223_s22, 4  ;;  %s31_s23 = int_to_ptr.vmem [resolvable:$true] %s30_s23 }
   0x8   :  { %36 = dma.hbm_to_vmem [thread:$0]  %s29_s19, 2048, %s31_s23, [#allocation6], %s221_s20, %s221_s20, %s222_s21  }
   0x9   :  { %214 = dma.done.wait [#allocation3], 256  }
   0xa   :  { %215 = vsyncadd [#allocation3], 4294967040 }
   0xb   :  { %216 = dma.done.wait [#allocation6], 2048  }
   0xc   :  { %217 = vsyncadd [#allocation6], 4294965248  ;;  %v64_v0 = vld [vmem:[#allocation5 + $0x78] sm:$0xff]  ;;  %v63_v1 = vld [vmem:[#allocation5 + $0x70] sm:$0xff]  ;;  %s224_s24 = smov [#allocation7]   ;;  %s102_s28 = sshll.u32 %s269_s3, 4  ;;  %s103_s28 = int_to_ptr.hbm [resolvable:$true] %s102_s28 }
   0xd   :  { %69 = vmatpush.msra.mxu0 %v64_v0  ;;  %116 = vmatpush.msra.mxu1 %v64_v0  ;;  %v62_v2 = vld [vmem:[#allocation5 + $0x68] sm:$0xff]  ;;  %v61_v3 = vld [vmem:[#allocation5 + $0x60] sm:$0xff]  ;;  %v60_v4 = vld [vmem:[#allocation5 + $0x58] sm:$0xff]  ;;  %s100_s25 = sshll.u32 %s224_s24, 4  ;;  %s101_s25 = int_to_ptr.vmem [resolvable:$true] %s100_s25 }
   0xe   :  { %v59_v5 = vld [vmem:[#allocation5 + $0x50] sm:$0xff]  ;;  %v58_v6 = vld [vmem:[#allocation5 + $0x48] sm:$0xff]  ;;  %v57_v7 = vld [vmem:[#allocation5 + $0x40] sm:$0xff] }
   0xf   :  { %70 = vmatpush.msra.mxu0 %v63_v1  ;;  %117 = vmatpush.msra.mxu1 %v63_v1  ;;  %v56_v8 = vld [vmem:[#allocation5 + $0x38] sm:$0xff]  ;;  %v55_v9 = vld [vmem:[#allocation5 + $0x30] sm:$0xff]  ;;  %v54_v10 = vld [vmem:[#allocation5 + $0x28] sm:$0xff] }
  0x10   :  { %v53_v11 = vld [vmem:[#allocation5 + $0x20] sm:$0xff]  ;;  %v52_v12 = vld [vmem:[#allocation5 + $0x18] sm:$0xff]  ;;  %v51_v13 = vld [vmem:[#allocation5 + $0x10] sm:$0xff] }
  0x11   :  { %71 = vmatpush.msra.mxu0 %v62_v2  ;;  %118 = vmatpush.msra.mxu1 %v62_v2  ;;  %v50_v14 = vld [vmem:[#allocation5 + $0x8] sm:$0xff]  ;;  %v49_v15 = vld [vmem:[#allocation5] sm:$0xff]  ;;  %v47_v16 = vld [vmem:[#allocation2] sm:$0xff] }
  0x12   :  { %v48_v17 = vld [vmem:[#allocation2 + $0x8] sm:$0xff]  ;;  %v137_v18 = vld [vmem:[%s268_s2] ss:$0 sm:$0xff] }
  0x13   :  { %72 = vmatpush.msra.mxu0 %v61_v3  ;;  %119 = vmatpush.msra.mxu1 %v61_v3 }
  0x15   :  { %73 = vmatpush.msra.mxu0 %v60_v4  ;;  %120 = vmatpush.msra.mxu1 %v60_v4 }
  0x17   :  { %74 = vmatpush.msra.mxu0 %v59_v5  ;;  %121 = vmatpush.msra.mxu1 %v59_v5 }
  0x19   :  { %75 = vmatpush.msra.mxu0 %v58_v6  ;;  %122 = vmatpush.msra.mxu1 %v58_v6 }
  0x1b   :  { %76 = vmatpush.msra.mxu0 %v57_v7  ;;  %123 = vmatpush.msra.mxu1 %v57_v7 }
  0x1d   :  { %77 = vmatpush.msra.mxu0 %v56_v8  ;;  %124 = vmatpush.msra.mxu1 %v56_v8 }
  0x1f   :  { %78 = vmatpush.msra.mxu0 %v55_v9  ;;  %125 = vmatpush.msra.mxu1 %v55_v9 }
  0x21   :  { %79 = vmatpush.msra.mxu0 %v54_v10  ;;  %126 = vmatpush.msra.mxu1 %v54_v10 }
  0x23   :  { %80 = vmatpush.msra.mxu0 %v53_v11  ;;  %127 = vmatpush.msra.mxu1 %v53_v11 }
  0x25   :  { %81 = vmatpush.msra.mxu0 %v52_v12  ;;  %128 = vmatpush.msra.mxu1 %v52_v12 }
  0x27   :  { %82 = vmatpush.msra.mxu0 %v51_v13  ;;  %129 = vmatpush.msra.mxu1 %v51_v13 }
  0x29   :  { %83 = vmatpush.msra.mxu0 %v50_v14  ;;  %130 = vmatpush.msra.mxu1 %v50_v14 }
  0x2b   :  { %84 = vmatpush.msra.mxu0 %v49_v15  ;;  %131 = vmatpush.msra.mxu1 %v49_v15 }
  0x2c   :  { %85 = vmatmul.f32.vlgmr.msra.gmra.mxu0 %v47_v16  ;;  %88 = vmatmul.f32.vlgmr.msra.gmra.mxu1 %v48_v17 }
  0xa9   :  { %v86_v19 = vpop.f32.mrf.mxu0  ;;  %v89_v20 = vpop.f32.mrf.mxu1 }
  0xaa   :  { %v87_v21 = vadd.f32 %v137_v18, %v86_v19  ;;  %v90_v22 = vadd.f32 %v137_v18, %v89_v20 }
  0xac   :  { %138 = vtanh.f32 %v87_v21 }
  0xad   :  { %140 = vtanh.f32 %v90_v22 }
  0xb2   :  { %v139_v23 = vpop.eup %138 }
  0xb3   :  { %v141_v24 = vpop.eup %140  ;;  %94 = vst [vmem:[#allocation7] sm:$0xff] %v139_v23 }
  0xb4   :  { %95 = vst [vmem:[#allocation7 + $0x8] sm:$0xff] %v141_v24 }
  0xb5   :  { %108 = dma.vmem_to_hbm [thread:$0]  %s101_s25, 256, %s103_s28, [#allocation4], %s221_s20, %s221_s20, %s222_s21  }
  0xb6   :  { %218 = dma.done.wait [#allocation4], 256  }
  0xb7   :  { %219 = vsyncadd [#allocation4], 4294967040 }
  0xb8   :  { %113 = vsyncpa [#allocation3], 1 }
  0xb9   :  { %114 = vsyncpa [#allocation6], 1 }
  0xba   :  { %115 = vsyncpa [#allocation4], 1 }

</bundles_post_ra>
